<compile_context>
chip_gen: v6e
topology: v6e:2x2x1
jax: 0.10.0
libtpu: 0.0.40
codegen_flags: <defaults>
</compile_context>

<pallas_src>
import functools

import numpy as np
import jax
import jax.numpy as jnp
from jax.experimental import pallas as pl
from jax.experimental.pallas import tpu as pltpu


def _round_up(x: int, m: int) -> int:
    return ((x + m - 1) // m) * m


def _adaptive_pool_matrix(n_in: int, n_out: int) -> np.ndarray:
    """Row i averages input[start:end), start=floor(i*n_in/n_out),
    end=ceil((i+1)*n_in/n_out) -- identical to torch AdaptiveAvgPool semantics."""
    m = np.zeros((n_out, n_in), dtype=np.float32)
    for i in range(n_out):
        start = (i * n_in) // n_out
        end = -((-(i + 1) * n_in) // n_out)
        m[i, start:end] = 1.0 / float(end - start)
    return m


@functools.lru_cache(maxsize=None)
def _vmem_limit_bytes() -> int:
    """Generation-aware scoped VMEM limit: ~3/4 of per-core physical VMEM, <=96 MiB.
    v5e/v6e (128 MiB physical) -> 96 MiB; v7x (64 MiB physical) -> 48 MiB."""
    try:
        cap = int(pltpu.get_tpu_info().vmem_capacity_bytes)
    except Exception:
        cap = 64 * 1024 * 1024          # conservative default (v7x per-TensorCore)
    return min(cap * 3 // 4, 96 * 1024 * 1024)


def _choose_batch_tile(B: int, row_bytes: int, fixed_bytes: int, vmem_limit: int):
    """Pick (tb, n_blocks) for the batch axis without ever copying/padding x.

    row_bytes   VMEM bytes one batch row costs in-kernel (lane/sublane padded,
                double buffering + f32 promotion included).
    fixed_bytes VMEM bytes independent of tb (pooling-matrix blocks + slack).
    """
    budget = max(vmem_limit - fixed_bytes, 8 * row_bytes)
    max_tb = max(8, int(budget // row_bytes) // 8 * 8)

    if B <= 8:
        return B, 1                                   # single tiny full-batch block
    if B % 8 != 0:
        if B <= max_tb:
            return B, 1                               # block == full batch dim: legal, exact
        # Rare: large batch not divisible by 8.  Multiple-of-8 tiles; Pallas clamps the
        # final edge block (no extra HBM traffic, padded output rows are discarded).
        return max_tb, int(pl.cdiv(B, max_tb))

    # B is a multiple of 8: use a multiple-of-8 divisor of B (no edge block at all).
    min_blocks = 2 if B >= 16 else 1                  # >=2: pipeline DMAs + feed both v7x TCs
    tb = min(max_tb, max(8, (B // min_blocks) // 8 * 8))
    while B % tb:
        tb -= 8                                       # 8 always divides B here
    n_blocks = B // tb
    if n_blocks > 1 and n_blocks % 2:
        # Odd block count leaves one v7x TensorCore ~idle at the end; halve the tile
        # if that yields an even, exact split and tiles stay >= 8 rows.
        half = tb // 2
        if half >= 8 and half % 8 == 0 and B % half == 0:
            tb, n_blocks = half, B // half
    return int(tb), int(n_blocks)


# ---------------------------------------------------------------------------
# Path 1: fused single matmul   out = x2 @ P,   P = kron(A, Bpool)^T  (N*E, H*W)
# ---------------------------------------------------------------------------
def _fused_kernel(x_ref, p_ref, o_ref):
    # x_ref: (TB, N*E)   p_ref: (N*E, H*W) f32   o_ref: (TB, H*W)
    o_ref[...] = jnp.dot(
        x_ref[...], p_ref[...], preferred_element_type=jnp.float32
    ).astype(o_ref.dtype)


# ---------------------------------------------------------------------------
# Path 2: big-M E->W MXU matmul + tiny unrolled N->H reduction (large N*E shapes)
# ---------------------------------------------------------------------------
def _two_stage_kernel(a_ref, x_ref, bt_ref, o_ref):
    # a_ref: (H, N, 1) f32   x_ref: (TB, N, E)   bt_ref: (E, W) f32   o_ref: (TB, H*W)
    TB, N, E = x_ref.shape
    H = a_ref.shape[0]
    W = bt_ref.shape[1]
    # Layout-free collapse (wrapper guarantees N % 8 == 0): one big-M MXU matmul.
    y = jnp.dot(
        x_ref[...].reshape(TB * N, E), bt_ref[...], preferred_element_type=jnp.float32
    ).reshape(TB, N, W)
    a = a_ref[...]                                            # (H, N, 1) f32
    # N -> H pooling: H is small & static; VPU/XLU filler next to the HBM stream.
    parts = [jnp.sum(y * a[h], axis=1) for h in range(H)]     # each (TB, W) f32
    # One full-block store instead of H masked partial stores.
    o_ref[...] = jnp.concatenate(parts, axis=-1).astype(o_ref.dtype)


def blind_pooling_2d(x: jax.Array, H: int, W: int, *, force_two_stage: bool = False) -> jax.Array:
    """x: [B, N, E] -> [B, H*W], exact AdaptiveAvgPool2d((H, W)) semantics."""
    B, N, E = x.shape
    HW = H * W
    out_dtype = x.dtype
    itemsize = x.dtype.itemsize
    promote = 4 if itemsize < 4 else 0            # in-kernel f32 copy when x is sub-32-bit
    if B == 0:
        return jnp.zeros((0, HW), out_dtype)

    vmem_limit = _vmem_limit_bytes()
    A = _adaptive_pool_matrix(N, H)               # (H, N) f32, exact weights
    Bp = _adaptive_pool_matrix(E, W)              # (W, E) f32

    sem = pltpu.CompilerParams(dimension_semantics=("parallel",),
                               vmem_limit_bytes=vmem_limit)

    # ---------------- fused path (small/medium N*E) ----------------
    K = N * E
    p_tile_bytes = 2 * _round_up(K, 8) * _round_up(HW, 128) * 4      # double-buffered f32 P
    fused_ok = (not force_two_stage) and p_tile_bytes <= min(8 * 1024 * 1024, vmem_limit // 4)

    if fused_ok:
        P = jnp.asarray(np.kron(A, Bp).T)                            # (N*E, H*W) f32
        x2 = x.reshape(B, K)                                         # metadata-only for contiguous x
        row_bytes = (_round_up(K, 128) * (2 * itemsize + promote)    # x tile (dbl-buf + f32 copy)
                     + _round_up(HW, 128) * (2 * itemsize + 4))      # out tile (dbl-buf + f32 acc)
        fixed = p_tile_bytes + (1 << 20)                             # P buffers + compiler slack
        tb, n_blocks = _choose_batch_tile(B, row_bytes, fixed, vmem_limit)
        cost = pl.CostEstimate(flops=2 * B * K * HW, transcendentals=0,
                               bytes_accessed=B * K * itemsize + K * HW * 4 + B * HW * itemsize)
        return pl.pallas_call(
            _fused_kernel,
            out_shape=jax.ShapeDtypeStruct((B, HW), out_dtype),
            grid=(n_blocks,),
            in_specs=[
                pl.BlockSpec((tb, K), lambda b: (b, 0)),             # x batch tile (lane-dense)
                pl.BlockSpec((K, HW), lambda b: (0, 0)),             # fused pooling matrix (constant)
            ],
            out_specs=pl.BlockSpec((tb, HW), lambda b: (b, 0)),
            compiler_params=sem,
            cost_estimate=cost,
        )(x2, P)

    # ---------------- two-stage path (large N*E) ----------------
    # In-kernel (TB,N,E)->(TB*N,E) collapse is layout-free only when N % 8 == 0.
    # Only this rare large-N*E + ragged-N case ever copies x (zero rows get zero weight).
    Np = _round_up(N, 8)
    if Np != N:
        x = jnp.pad(x, ((0, 0), (0, Np - N), (0, 0)))
        A = np.concatenate([A, np.zeros((H, Np - N), np.float32)], axis=1)
    A3 = jnp.asarray(A).reshape(H, Np, 1)                            # (H, Np, 1) f32
    Bt = jnp.asarray(Bp.T)                                           # (E, W) f32

    row_bytes = (_round_up(Np, 8) * _round_up(E, 128) * (2 * itemsize + promote)  # x tile
                 + _round_up(Np, 8) * _round_up(W, 128) * 4                       # y intermediate
                 + _round_up(HW, 128) * (2 * itemsize + 4))                       # out tile
    fixed = (2 * H * _round_up(Np, 8) * 128 * 4                                   # A3 buffers
             + 2 * _round_up(E, 8) * _round_up(W, 128) * 4                        # Bt buffers
             + (1 << 20))
    tb, n_blocks = _choose_batch_tile(B, row_bytes, fixed, vmem_limit)
    cost = pl.CostEstimate(flops=2 * B * Np * E * W + 2 * B * Np * W * H, transcendentals=0,
                           bytes_accessed=B * Np * E * itemsize + B * HW * itemsize)
    return pl.pallas_call(
        _two_stage_kernel,
        out_shape=jax.ShapeDtypeStruct((B, HW), out_dtype),
        grid=(n_blocks,),
        in_specs=[
            pl.BlockSpec((H, Np, 1), lambda b: (0, 0, 0)),           # A (constant block)
            pl.BlockSpec((tb, Np, E), lambda b: (b, 0, 0)),          # x batch tile
            pl.BlockSpec((E, W), lambda b: (0, 0)),                  # Bt (constant block)
        ],
        out_specs=pl.BlockSpec((tb, HW), lambda b: (b, 0)),
        compiler_params=sem,
        cost_estimate=cost,
    )(A3, x, Bt)


def _reference(x: np.ndarray, H: int, W: int) -> np.ndarray:
    """Pure-numpy adaptive avg pool reference (torch semantics)."""
    B, N, E = x.shape
    out = np.zeros((B, H, W), dtype=np.float32)
    for i in range(H):
        rs = (i * N) // H
        re = -((-(i + 1) * N) // H)
        for j in range(W):
            cs = (j * E) // W
            ce = -((-(j + 1) * E) // W)
            out[:, i, j] = x[:, rs:re, cs:ce].mean(axis=(1, 2))
    return out.reshape(B, H * W)


if __name__ == "__main__":
    H, W = 4, 8
    key = jax.random.PRNGKey(0)
    k1, k2 = jax.random.split(key)

    # Case 1: fused single-matmul path, two balanced grid steps (B=16 -> tb=8, grid=(2,)).
    B, N, E = 16, 16, 32
    x = jax.random.normal(k1, (B, N, E), dtype=jnp.float32)
    ref = _reference(np.asarray(x), H, W)
    out = jax.block_until_ready(blind_pooling_2d(x, H, W))
    np.testing.assert_allclose(np.asarray(out), ref, rtol=1e-5, atol=1e-5)
    assert out.shape == (B, H * W)

    # Case 2: ragged small batch -> one full-batch block, no padding copy anywhere.
    B2 = 3
    x2 = jax.random.normal(k2, (B2, N, E), dtype=jnp.float32)
    out2 = jax.block_until_ready(blind_pooling_2d(x2, H, W))
    np.testing.assert_allclose(np.asarray(out2), _reference(np.asarray(x2), H, W),
                               rtol=1e-5, atol=1e-5)
    assert out2.shape == (B2, H * W)

    # Case 3: the large-N*E fallback (big-M MXU matmul + N->H reduction), forced at small shape.
    out3 = jax.block_until_ready(blind_pooling_2d(x, H, W, force_two_stage=True))
    np.testing.assert_allclose(np.asarray(out3), ref, rtol=1e-5, atol=1e-5)

    print("KERNEL_OK")
</pallas_src>

<mosaic_0001>
module attributes {stable_mosaic.version = 11 : i64} {
  func.func @_fused_kernel(%arg0: i32, %arg1: memref<8x512xf32, #tpu.memory_space<vmem>>, %arg2: memref<512x32xf32, #tpu.memory_space<vmem>>, %arg3: memref<8x32xf32, #tpu.memory_space<vmem>>) attributes {dimension_semantics = [#tpu.dimension_semantics<parallel>], iteration_bounds = array<i64: 2>, scalar_prefetch = 0 : i64, scratch_operands = 0 : i64, tpu.core_type = #tpu.core_type<tc>, window_params = [{transform_indices = @transform_0, window_bounds = array<i64: 8, 512>}, {pipeline_mode = #tpu.pipeline_mode<synchronous>, transform_indices = @transform_1, window_bounds = array<i64: 512, 32>}, {transform_indices = @transform_2, window_bounds = array<i64: 8, 32>}]} {
    %c0 = arith.constant 0 : index
    %c0_0 = arith.constant 0 : index
    %0 = vector.load %arg1[%c0, %c0_0] : memref<8x512xf32, #tpu.memory_space<vmem>>, vector<8x512xf32>
    %c0_1 = arith.constant 0 : index
    %c0_2 = arith.constant 0 : index
    %1 = vector.load %arg2[%c0_1, %c0_2] : memref<512x32xf32, #tpu.memory_space<vmem>>, vector<512x32xf32>
    %cst = arith.constant dense<0.000000e+00> : vector<8x32xf32>
    %2 = tpu.matmul %0, %1, %cst {dimension_numbers = #tpu.dot_dimension_numbers<[1], [0], [0], [1], [0, 0, 1, 1], [], []>} : vector<8x512xf32>, vector<512x32xf32>, vector<8x32xf32> -> vector<8x32xf32>
    %c0_3 = arith.constant 0 : index
    %c0_4 = arith.constant 0 : index
    %3 = vector.load %arg3[%c0_3, %c0_4] : memref<8x32xf32, #tpu.memory_space<vmem>>, vector<8x32xf32>
    tpu.vector_store %arg3[%c0_3, %c0_4], %2 {strides = array<i32>} : memref<8x32xf32, #tpu.memory_space<vmem>>, vector<8x32xf32>,
    return
  }
  func.func @transform_0(%arg0: i32) -> (i32, i32) {
    %c0_i32 = arith.constant 0 : i32
    %c0_i32_0 = arith.constant 0 : i32
    return %arg0, %c0_i32 : i32, i32
  }
  func.func @transform_1(%arg0: i32) -> (i32, i32) {
    %c0_i32 = arith.constant 0 : i32
    %c0_i32_0 = arith.constant 0 : i32
    %c0_i32_1 = arith.constant 0 : i32
    return %c0_i32, %c0_i32_0 : i32, i32
  }
  func.func @transform_2(%arg0: i32) -> (i32, i32) {
    %c0_i32 = arith.constant 0 : i32
    %c0_i32_0 = arith.constant 0 : i32
    return %arg0, %c0_i32 : i32, i32
  }
}

</mosaic_0001>

<bundles_post_ra>
// kernel: tpu_custom_call.1
= control target key start
LH: loop header
LB: loop body
LE: loop exit
PB: predicated region body
PF: predicated region fallthrough
CT: control target
= control target key end

     0   :  { %7 = vsyncpa [#allocation3], 0  ;;  %s908_s0 = inlined_call_operand.vmem [shape: f32[16,512], index: 0, kind: input, shape index: {}]   ;;  %s909_s1 = inlined_call_operand.vmem [shape: f32[512,32], index: 1, kind: input, shape index: {}]   ;;  %s910_s2 = inlined_call_operand.hbm [shape: f32[16,32], index: 2, kind: output, shape index: {}]  }
   0x1   :  { %9 = vsyncpa [#allocation3 + $0x1], 0  ;;  %s624_s9 = smov 0   ;;  %s626_s10 = smov 0  }
   0x2   :  { %s628_s11 = smov 0   ;;  %s630_s12 = smov 0  }
   0x3 LB: > { %s645_s13 = sadd.s32 4294967295, %s606_s12   ;;  %s425_s14 = sadd.s32 4294967294, %s606_s12   ;;  %s606_s12 = sphi %s630_s12, %s916_s12   ;;  %s602_s11 = sphi %s628_s11, %s915_s11   ;;  %s598_s10 = sphi %s626_s10, %s914_s10   ;;  %s594_s9 = sphi %s624_s9, %s913_s9  }
   0x4   : > { %s649_s15 = sadd.s32 1, %s606_s12   ;;  %s69_s16 = sadd.s32 1, %s602_s11 }
   0x5   : > { %s66_s17 = ssub.s32 %s606_s12, %s649_s15  ;;  %p79_p0 = scmp.ne.s32.totalorder %s602_s11, %s598_s10 }
   0x6   : > { %p67_p1 = scmp.eq.s32.totalorder %s66_s17, 0  ;;  %p80_p2 = scmp.eq.s32.totalorder %s645_s13, 1 }
   0x7   : > { %p85_p3 = scmp.ne.s32.totalorder %s598_s10, %s594_s9  ;;  %p86_p4 = scmp.eq.s32.totalorder %s425_s14, 1 }
   0x8   : > { %s660_s18 = scalar_select %p67_p1, %s602_s11, %s69_s16  }
   0x9   : > { %p662_p5 = por %p80_p2, %p79_p0  ;;  %p666_p6 = por %p86_p4, %p85_p3 }
   0xa   : > { %p428_p7 = scmp.ge.s32.totalorder %s606_s12, 1  ;;  %p115_p8 = scmp.lt.s32.totalorder %s606_s12, 3 }
   0xc   : > { %p116_p9 = pnand %p428_p7, %p115_p8 }
   0xd   : > { %p137_p10 = scmp.lt.s32.totalorder (!%p116_p9), %s645_s13, 1  ;;  %s433_s23 = sshll.u32 (!%p116_p9), %s645_s13, 7 }
   0xe   : > { %119 = sbr.rel (%p116_p9) target bundleno = 267 (0x10b), region = 28  ;;  %s364_s28 = scalar_lea.hbm (!%p116_p9), %s910_s2, %s433_s23 }
   0xf   : > { %s608_s4 = smov (!%p116_p9), [#allocation2]  }
  0x13   : > { %v177_v0 = vld [vmem:[%s909_s1 + $0xf8] sm:$0xff]  ;;  %v176_v4 = vld [vmem:[%s909_s1 + $0xf0] sm:$0xff]  ;;  %v175_v8 = vld [vmem:[%s909_s1 + $0xe8] sm:$0xff]  ;;  %s808_s5 = scalar_select %p137_p10, %s645_s13, 1  ;;  %vm350_vm0 = vcmask 261120  }
  0x14   : > { %v209_v1 = vld [vmem:[%s909_s1 + $0x1f8] sm:$0xff]  ;;  %437 = vmatprep.subr.mxu0 %v177_v0  ;;  %v208_v5 = vld [vmem:[%s909_s1 + $0x1f0] sm:$0xff]  ;;  %v207_v9 = vld [vmem:[%s909_s1 + $0x1e8] sm:$0xff]  ;;  %s550_s13 = sshll.u32 %s608_s4, 4  ;;  %s551_s13 = int_to_ptr.vmem [resolvable:$false] %s550_s13 }
  0x15   : > { %v161_v2 = vld [vmem:[%s909_s1 + $0x78] sm:$0xff]  ;;  %472 = vmatprep.subr.mxu1 %v209_v1  ;;  %v160_v6 = vld [vmem:[%s909_s1 + $0x70] sm:$0xff]  ;;  %v159_v10 = vld [vmem:[%s909_s1 + $0x68] sm:$0xff]  ;;  %s436_s3 = sshll.u32 %s808_s5, 5  ;;  %s134_s5 = sand.u32 1, %s598_s10  }
  0x16   : > { %v193_v3 = vld [vmem:[%s909_s1 + $0x178] sm:$0xff]  ;;  %438 = vmatpush3.msra.mxu0 %v161_v2  ;;  %v192_v7 = vld [vmem:[%s909_s1 + $0x170] sm:$0xff]  ;;  %v191_v11 = vld [vmem:[%s909_s1 + $0x168] sm:$0xff]  ;;  %s141_s27 = scalar_lea.vmem %s908_s0, %s436_s3  ;;  %s429_s22 = sshll.u32 %s134_s5, 3 }
  0x17   : > { %473 = vmatpush3.msra.mxu1 %v193_v3  ;;  %439 = vmatprep.subr.mxu0 %v176_v4  ;;  %v174_v12 = vld [vmem:[%s909_s1 + $0xe0] sm:$0xff]  ;;  %v173_v16 = vld [vmem:[%s909_s1 + $0xd8] sm:$0xff]  ;;  %v172_v20 = vld [vmem:[%s909_s1 + $0xd0] sm:$0xff]  ;;  %s136_s24 = scalar_lea.vmem [#allocation2], %s429_s22  ;;  %s353_s29 = scalar_lea.sflag [#allocation3], %s134_s5 }
  0x18   : > { %474 = vmatprep.subr.mxu1 %v208_v5  ;;  %440 = vmatpush3.msra.mxu0 %v160_v6  ;;  %v206_v13 = vld [vmem:[%s909_s1 + $0x1e0] sm:$0xff]  ;;  %v205_v17 = vld [vmem:[%s909_s1 + $0x1d8] sm:$0xff]  ;;  %v204_v21 = vld [vmem:[%s909_s1 + $0x1d0] sm:$0xff]  ;;  %s366_s25 = sshll.u32 %s136_s24, 4  ;;  %s552_s6 = scalar_lea.vmem %s551_s13, 256  ;;  %s367_s25 = int_to_ptr.vmem [resolvable:$true] %s366_s25 }
  0x19   : > { %475 = vmatpush3.msra.mxu1 %v192_v7  ;;  %441 = vmatprep.subr.mxu0 %v175_v8  ;;  %v158_v14 = vld [vmem:[%s909_s1 + $0x60] sm:$0xff]  ;;  %v157_v18 = vld [vmem:[%s909_s1 + $0x58] sm:$0xff]  ;;  %v156_v22 = vld [vmem:[%s909_s1 + $0x50] sm:$0xff]  ;;  %s546_s30 = scalar_lea.vmem %s367_s25, 128  ;;  %p553_p0 = scmp.lt.s32.totalorder %s367_s25, %s551_s13 }
  0x1a   : > { %476 = vmatprep.subr.mxu1 %v207_v9  ;;  %v190_v15 = vld [vmem:[%s909_s1 + $0x160] sm:$0xff]  ;;  %442 = vmatpush3.msra.mxu0 %v159_v10  ;;  %v189_v19 = vld [vmem:[%s909_s1 + $0x158] sm:$0xff]  ;;  %v188_v23 = vld [vmem:[%s909_s1 + $0x150] sm:$0xff]  ;;  %p547_p11 = scmp.ne.s32.totalorder %s367_s25, %s546_s30  ;;  %p554_p1 = scmp.lt.s32.totalorder %s552_s6, %s546_s30 }
  0x1b   : > { %477 = vmatpush3.msra.mxu1 %v191_v11  ;;  %443 = vmatprep.subr.mxu0 %v174_v12  ;;  %v171_v24 = vld [vmem:[%s909_s1 + $0xc8] sm:$0xff]  ;;  %v170_v28 = vld [vmem:[%s909_s1 + $0xc0] sm:$0xff]  ;;  %v169_v32 = vld [vmem:[%s909_s1 + $0xb8] sm:$0xff] }
  0x1c   : > { %478 = vmatprep.subr.mxu1 %v206_v13  ;;  %444 = vmatpush3.msra.mxu0 %v158_v14  ;;  %v203_v25 = vld [vmem:[%s909_s1 + $0x1c8] sm:$0xff]  ;;  %v202_v29 = vld [vmem:[%s909_s1 + $0x1c0] sm:$0xff]  ;;  %v201_v33 = vld [vmem:[%s909_s1 + $0x1b8] sm:$0xff]  ;;  %p548_p12 = pnand %p547_p11, %p662_p5  ;;  %p555_p2 = por %p554_p1, %p553_p0 }
  0x1d   : > { %479 = vmatpush3.msra.mxu1 %v190_v15  ;;  %445 = vmatprep.subr.mxu0 %v173_v16  ;;  %v155_v26 = vld [vmem:[%s909_s1 + $0x48] sm:$0xff]  ;;  %v154_v30 = vld [vmem:[%s909_s1 + $0x40] sm:$0xff]  ;;  %v153_v34 = vld [vmem:[%s909_s1 + $0x38] sm:$0xff] }
  0x1e   : > { %480 = vmatprep.subr.mxu1 %v205_v17  ;;  %446 = vmatpush3.msra.mxu0 %v157_v18  ;;  %v187_v27 = vld [vmem:[%s909_s1 + $0x148] sm:$0xff]  ;;  %v186_v31 = vld [vmem:[%s909_s1 + $0x140] sm:$0xff]  ;;  %v185_v35 = vld [vmem:[%s909_s1 + $0x138] sm:$0xff]  ;;  %p549_p13 = pneg %p548_p12 }
  0x1f   : > { %481 = vmatpush3.msra.mxu1 %v189_v19  ;;  %447 = vmatprep.subr.mxu0 %v172_v20  ;;  %v168_v36 = vld [vmem:[%s909_s1 + $0xb0] sm:$0xff]  ;;  %v167_v40 = vld [vmem:[%s909_s1 + $0xa8] sm:$0xff]  ;;  %v166_v44 = vld [vmem:[%s909_s1 + $0xa0] sm:$0xff] }
  0x20   : > { %482 = vmatprep.subr.mxu1 %v204_v21  ;;  %448 = vmatpush3.msra.mxu0 %v156_v22  ;;  %v200_v37 = vld [vmem:[%s909_s1 + $0x1b0] sm:$0xff]  ;;  %v199_v41 = vld [vmem:[%s909_s1 + $0x1a8] sm:$0xff]  ;;  %v198_v45 = vld [vmem:[%s909_s1 + $0x1a0] sm:$0xff]  ;;  %p556_p3 = pnand %p555_p2, %p549_p13 }
  0x21   : > { %483 = vmatpush3.msra.mxu1 %v188_v23  ;;  %449 = vmatprep.subr.mxu0 %v171_v24  ;;  %v152_v38 = vld [vmem:[%s909_s1 + $0x30] sm:$0xff]  ;;  %v151_v42 = vld [vmem:[%s909_s1 + $0x28] sm:$0xff]  ;;  %v150_v46 = vld [vmem:[%s909_s1 + $0x20] sm:$0xff] }
  0x22   : > { %484 = vmatprep.subr.mxu1 %v203_v25  ;;  %450 = vmatpush3.msra.mxu0 %v155_v26  ;;  %v184_v39 = vld [vmem:[%s909_s1 + $0x130] sm:$0xff]  ;;  %v183_v43 = vld [vmem:[%s909_s1 + $0x128] sm:$0xff]  ;;  %v182_v47 = vld [vmem:[%s909_s1 + $0x120] sm:$0xff] }
  0x23   : > { %485 = vmatpush3.msra.mxu1 %v187_v27  ;;  %451 = vmatprep.subr.mxu0 %v170_v28  ;;  %v165_v48 = vld [vmem:[%s909_s1 + $0x98] sm:$0xff]  ;;  %v164_v52 = vld [vmem:[%s909_s1 + $0x90] sm:$0xff]  ;;  %v163_v56 = vld [vmem:[%s909_s1 + $0x88] sm:$0xff] }
  0x24   : > { %486 = vmatprep.subr.mxu1 %v202_v29  ;;  %452 = vmatpush3.msra.mxu0 %v154_v30  ;;  %v197_v49 = vld [vmem:[%s909_s1 + $0x198] sm:$0xff]  ;;  %v196_v53 = vld [vmem:[%s909_s1 + $0x190] sm:$0xff]  ;;  %v195_v57 = vld [vmem:[%s909_s1 + $0x188] sm:$0xff] }
  0x25   : > { %487 = vmatpush3.msra.mxu1 %v186_v31  ;;  %453 = vmatprep.subr.mxu0 %v169_v32  ;;  %v149_v50 = vld [vmem:[%s909_s1 + $0x18] sm:$0xff]  ;;  %v148_v54 = vld [vmem:[%s909_s1 + $0x10] sm:$0xff]  ;;  %v147_v58 = vld [vmem:[%s909_s1 + $0x8] sm:$0xff] }
  0x26   : > { %488 = vmatprep.subr.mxu1 %v201_v33  ;;  %454 = vmatpush3.msra.mxu0 %v153_v34  ;;  %v181_v51 = vld [vmem:[%s909_s1 + $0x118] sm:$0xff]  ;;  %v180_v55 = vld [vmem:[%s909_s1 + $0x110] sm:$0xff]  ;;  %v179_v59 = vld [vmem:[%s909_s1 + $0x108] sm:$0xff] }
  0x27   : > { %489 = vmatpush3.msra.mxu1 %v185_v35  ;;  %455 = vmatprep.subr.mxu0 %v168_v36  ;;  %v162_v60 = vld [vmem:[%s909_s1 + $0x80] sm:$0xff]  ;;  %v143_v63 = vld [vmem:[%s141_s27 + $0x8] sm:$0xff]  ;;  %v145_v1 = vld [vmem:[%s141_s27 + $0x18] sm:$0xff] }
  0x28   : > { %490 = vmatprep.subr.mxu1 %v200_v37  ;;  %456 = vmatpush3.msra.mxu0 %v152_v38  ;;  %v194_v61 = vld [vmem:[%s909_s1 + $0x180] sm:$0xff]  ;;  %v144_v3 = vld [vmem:[%s141_s27 + $0x10] sm:$0xff] }
  0x29   : > { %491 = vmatpush3.msra.mxu1 %v184_v39  ;;  %457 = vmatprep.subr.mxu0 %v167_v40  ;;  %v146_v62 = vld [vmem:[%s909_s1] sm:$0xff] }
  0x2a   : > { %492 = vmatprep.subr.mxu1 %v199_v41  ;;  %458 = vmatpush3.msra.mxu0 %v151_v42  ;;  %v178_v0 = vld [vmem:[%s909_s1 + $0x100] sm:$0xff] }
  0x2b   : > { %493 = vmatpush3.msra.mxu1 %v183_v43  ;;  %459 = vmatprep.subr.mxu0 %v166_v44  ;;  %v142_v2 = vld [vmem:[%s141_s27] sm:$0xff] }
  0x2c   : > { %494 = vmatprep.subr.mxu1 %v198_v45  ;;  %460 = vmatpush3.msra.mxu0 %v150_v46 }
  0x2d   : > { %495 = vmatpush3.msra.mxu1 %v182_v47  ;;  %461 = vmatprep.subr.mxu0 %v165_v48 }
  0x2e   : > { %496 = vmatprep.subr.mxu1 %v197_v49  ;;  %462 = vmatpush3.msra.mxu0 %v149_v50 }
  0x2f   : > { %497 = vmatpush3.msra.mxu1 %v181_v51  ;;  %463 = vmatprep.subr.mxu0 %v164_v52 }
  0x30   : > { %498 = vmatprep.subr.mxu1 %v196_v53  ;;  %464 = vmatpush3.msra.mxu0 %v148_v54 }
  0x31   : > { %499 = vmatpush3.msra.mxu1 %v180_v55  ;;  %465 = vmatprep.subr.mxu0 %v163_v56 }
  0x32   : > { %500 = vmatprep.subr.mxu1 %v195_v57  ;;  %466 = vmatpush3.msra.mxu0 %v147_v58 }
  0x33   : > { %501 = vmatpush3.msra.mxu1 %v179_v59  ;;  %467 = vmatprep.subr.mxu0 %v162_v60 }
  0x34   : > { %502 = vmatprep.subr.mxu1 %v194_v61  ;;  %468 = vmatpush3.msra.mxu0 %v146_v62 }
  0x35   : > { %274 = vmatprep.mubr.f32.mxu0 %v143_v63  ;;  %503 = vmatpush3.msra.mxu1 %v178_v0 }
  0x36   : > { %344 = vmatprep.mubr.f32.mxu1 %v145_v1  ;;  %275 = vmatmul.mubr.f32.vlgmr.msra.gmra.mxu0 %v142_v2 }
  0x37   : > { %345 = vmatmul.mubr.f32.vlgmr.msra.gmra.mxu1 %v144_v3 }
  0xf6   : > { %v469_v4 = vpop.f32.mrf.mxu0 }
  0xf7   : > { %v504_v5 = vpop.f32.mrf.mxu1 }
  0xf8   : > { %v470_v6 = vpop.f32.mrf.mxu0 }
  0xf9   : > { %v505_v7 = vpop.f32.mrf.mxu1  ;;  %v471_v8 = vadd.f32 %v470_v6, %v469_v4 }
  0xfa   : > { %v506_v9 = vadd.f32 %v505_v7, %v504_v5 }
  0xfc   : > { %v347_v10 = vadd.f32 %v506_v9, %v471_v8 }
  0xfe   : > { %351 = vst.msk [vmem:[%s136_s24] sm:$0xff] %vm350_vm0, %v347_v10 }
  0xff   : > { %559 = shalt.err (!%p556_p3)
}
 0x100   : > { %s560_s7 = scalar_lea.hbm %s364_s28, 128  ;;  %s564_s3 = scalar_lea.hbm %s910_s2, 256 }
 0x101   : > { %p561_p4 = scmp.ne.s32.totalorder %s364_s28, %s560_s7  ;;  %p565_p9 = scmp.lt.s32.totalorder %s364_s28, %s910_s2 }
 0x102   : > { %p566_p10 = scmp.lt.s32.totalorder %s564_s3, %s560_s7 }
 0x103   : > { %p562_p7 = pnand %p561_p4, %p662_p5 }
 0x104   : > { %p567_p11 = por %p566_p10, %p565_p9 }
 0x105   : > { %p563_p8 = pneg %p562_p7 }
 0x107   : > { %p568_p12 = pnand %p567_p11, %p563_p8 }
 0x109   : > { %571 = shalt.err (!%p568_p12)
}
 0x10a   : > { %507 = dma.vmem_to_hbm [thread:$0]  (%p662_p5), %s367_s25, 128, %s364_s28, %s353_s29  }
 0x10b PF: > { %p513_p13 = scmp.ge.s32.totalorder %s606_s12, 2  ;;  %s378_s21 = sand.u32 1, %s594_s9  }
 0x10c   : > { %s379_s5 = scalar_lea.sflag [#allocation3], %s378_s21 }
 0x10d   : > { %p510_p0 = pnand %p513_p13, %p666_p6 }
 0x10f   : > { %p511_p1 = pneg %p510_p0 }
 0x111   : > { %589 = dma.done.wait (%p511_p1), %s379_s5, 128  }
 0x112   : > { %591 = vsyncadd (%p511_p1), %s379_s5, 4294967168  ;;  %p12_p2 = scmp.ge.s32.totalorder %s649_s15, 4   ;;  %s913_s9 = smov %s598_s10 }
 0x113   : > { %s914_s10 = smov %s602_s11  ;;  %s915_s11 = smov %s660_s18 }
 0x114   : > { %s916_s12 = smov %s649_s15  ;;  %14 = sbr.rel (!%p12_p2) target bundleno = 3 (0x3), region = 63 }
 0x119   :  { %384 = vsyncpa [#allocation3], 1 }
 0x11a   :  { %386 = vsyncpa [#allocation3 + $0x1], 1 }

</bundles_post_ra>
